<compile_context>
chip_gen: v6e
topology: v6e:2x2x1
jax: 0.10.0
libtpu: 0.0.40
codegen_flags: <defaults>
</compile_context>

<pallas_src>
import math

import jax
import jax.numpy as jnp
from jax.experimental import pallas as pl
from jax.experimental.pallas import tpu as pltpu


def _round_up(v, m):
    return ((v + m - 1) // m) * m


def _cdiv(a, b):
    return -(-a // b)


def _lane_pack_factor(sx, sy):
    """Smallest p such that p*sx and p*sy are both multiples of the 128-lane width."""
    p = 128 // math.gcd(128, sx)
    if (p * sy) % 128:
        p *= 128 // math.gcd(128, p * sy)
    return p


def _packed_matmul_kernel(w_ref, x_ref, out_ref):
    # One MXU dot per tile: (tile_rows, pack*Sx) @ (pack*Sx, pack*Sy).
    # Both operands and the result are lane-dense (last dim multiple of 128),
    # so loads/stores are unmasked and no transposes are needed anywhere.
    out_ref[...] = jnp.dot(
        x_ref[...], w_ref[...], preferred_element_type=jnp.float32
    ).astype(out_ref.dtype)


def graph_module_forward(x, adj_weight, out_proj, sparse_k, *,
                         compute_dtype=jnp.float32,
                         tile_rows=None,
                         min_pallas_rows=16384,
                         force_pallas=False):
    """x: (batch, channels, seg_num_x) f32 -> (batch, channels, seg_num_y) f32."""
    b, c, sx = x.shape
    sy = out_proj.shape[1]
    m = b * c

    # ---- x-independent glue (tiny (Sx,Sx)/(Sx,Sy) ops, runs once per call) ----
    # TODO(synk): jax.lax.top_k tie-breaking can differ from torch.topk on rows
    # of adj_weight with duplicate values (different but equally valid mask).
    _, idx = jax.lax.top_k(adj_weight, sparse_k)                      # (Sx, k)
    rows_i = jnp.arange(sx)[:, None]
    mask = jnp.zeros_like(adj_weight).at[rows_i, idx].set(1.0)        # (Sx, Sx)
    adj_sm = jax.nn.softmax(adj_weight * mask, axis=-1)               # zeros enter softmax

    # Small-problem fallback: a fused XLA GEMM beats kernel launch + packing
    # overhead when batch*channels is small.
    if not force_pallas and m < min_pallas_rows:
        h = jnp.matmul(x, adj_sm, precision=jax.lax.Precision.HIGHEST)
        return jnp.matmul(h, out_proj, precision=jax.lax.Precision.HIGHEST)

    # Fuse W = softmax(adj*mask) @ out_proj (x-independent), then block-diagonal
    # expand so the kernel sees lane-dense K/N:  W_bd = kron(I_pack, W).
    # NOTE: this re-associates (x@adj)@out_proj as x@(adj@out_proj); identical
    # mathematically, f32 rounding differs at ~1e-6 level.
    w = jnp.matmul(adj_sm, out_proj, precision=jax.lax.Precision.HIGHEST)   # (Sx, Sy)
    pack = _lane_pack_factor(sx, sy)
    kdim, ndim = pack * sx, pack * sy
    w_bd = jnp.kron(jnp.eye(pack, dtype=w.dtype), w).astype(compute_dtype)  # (kdim, ndim)

    # Lane-packed view of x: (B, C, Sx) -> (M, Sx) -> (M/pack, pack*Sx).
    # Pure row-major reshapes (no copy) whenever m % pack == 0.
    x2d = x.reshape(m, sx)
    m_pad = _round_up(m, pack)
    if m_pad != m:
        # One extra pass over x; only hit when batch*channels % pack != 0.
        x2d = jnp.pad(x2d, ((0, m_pad - m), (0, 0)))
    n_rows = m_pad // pack
    x_packed = x2d.reshape(n_rows, kdim).astype(compute_dtype)

    if tile_rows is None:
        # <= 4096 packed rows/step (~12 MiB double-buffered VMEM in f32 — safe
        # under v5e's 16 MiB scoped default and v7x's 64 MiB physical VMEM),
        # and >= 4 grid steps so v7x's two TensorCores each get >= 2 steps.
        tile_rows = min(4096, max(8, _round_up(_cdiv(n_rows, 4), 8)))
    grid = (_cdiv(n_rows, tile_rows),)   # partial last block handled by Pallas

    in_itemsize = jnp.dtype(compute_dtype).itemsize
    vmem_need = (2 * tile_rows * kdim * in_itemsize      # x tile, double-buffered
                 + 2 * tile_rows * ndim * 4              # f32 out tile, double-buffered
                 + 2 * kdim * ndim * in_itemsize)        # W_bd (constant index map)
    vmem_limit = int(max(32 * 1024 * 1024, vmem_need * 3 // 2))

    out_packed = pl.pallas_call(
        _packed_matmul_kernel,
        out_shape=jax.ShapeDtypeStruct((n_rows, ndim), jnp.float32),
        grid_spec=pltpu.PrefetchScalarGridSpec(
            num_scalar_prefetch=0,
            grid=grid,
            in_specs=[
                pl.BlockSpec((kdim, ndim), lambda i: (0, 0)),       # W_bd: tiny, resident
                pl.BlockSpec((tile_rows, kdim), lambda i: (i, 0)),  # x_packed row tile
            ],
            out_specs=pl.BlockSpec((tile_rows, ndim), lambda i: (i, 0)),
        ),
        compiler_params=pltpu.CompilerParams(
            dimension_semantics=("parallel",),
            vmem_limit_bytes=vmem_limit,
        ),
    )(w_bd, x_packed)

    out2d = out_packed.reshape(m_pad, sy)                 # free view back to (M, Sy)
    if m_pad != m:
        out2d = out2d[:m]
    return out2d.reshape(b, c, sy)


if __name__ == "__main__":
    # Small, deterministic setup consistent with the module's __init__.
    seg_num_x, seg_num_y, sparse_k = 8, 16, 4

    key = jax.random.PRNGKey(0)
    k_adj, k_proj, k_x1, k_x2 = jax.random.split(key, 4)

    adj_weight = jax.random.normal(k_adj, (seg_num_x, seg_num_x), jnp.float32) / seg_num_x ** 0.5
    out_proj = jax.random.normal(k_proj, (seg_num_x, seg_num_y), jnp.float32) / seg_num_x ** 0.5

    def reference(xr):
        # Pure-JAX reference of the exact PyTorch semantics (original association order).
        _, idx = jax.lax.top_k(adj_weight, sparse_k)
        msk = jnp.zeros_like(adj_weight).at[jnp.arange(seg_num_x)[:, None], idx].set(1.0)
        adj_ref = jax.nn.softmax(adj_weight * msk, axis=-1)
        h = jnp.matmul(xr, adj_ref, precision=jax.lax.Precision.HIGHEST)
        return jnp.matmul(h, out_proj, precision=jax.lax.Precision.HIGHEST)

    # Test 1: module-default tiny shapes; force the Pallas path (single partial
    # tile, exercises the m % pack padding branch).
    x1 = jax.random.normal(k_x1, (2, 4, seg_num_x), jnp.float32)
    out1 = graph_module_forward(x1, adj_weight, out_proj, sparse_k, force_pallas=True)
    jax.block_until_ready(out1)
    assert out1.shape == (2, 4, seg_num_y)
    assert jnp.allclose(out1, reference(x1), atol=1e-4, rtol=1e-4)

    # Test 2: slightly larger batch*channels (still small) to exercise a
    # multi-step auto-pipelined grid with exact pack divisibility.
    x2 = jax.random.normal(k_x2, (4, 96, seg_num_x), jnp.float32)
    out2 = graph_module_forward(x2, adj_weight, out_proj, sparse_k, force_pallas=True)
    jax.block_until_ready(out2)
    assert out2.shape == (4, 96, seg_num_y)
    assert jnp.allclose(out2, reference(x2), atol=1e-4, rtol=1e-4)

    # Test 3: default gating — at these sizes the fused XLA GEMM fallback runs.
    out3 = graph_module_forward(x1, adj_weight, out_proj, sparse_k)
    jax.block_until_ready(out3)
    assert jnp.allclose(out3, reference(x1), atol=1e-5, rtol=1e-5)

    print("KERNEL_OK")
</pallas_src>

<mosaic_0001>
module attributes {stable_mosaic.version = 11 : i64} {
  func.func @_packed_matmul_kernel(%arg0: i32, %arg1: memref<128x256xf32, #tpu.memory_space<vmem>>, %arg2: memref<8x128xf32, #tpu.memory_space<vmem>>, %arg3: memref<8x256xf32, #tpu.memory_space<vmem>>) attributes {dimension_semantics = [#tpu.dimension_semantics<parallel>], iteration_bounds = array<i64: 1>, scalar_prefetch = 0 : i64, scratch_operands = 0 : i64, tpu.core_type = #tpu.core_type<tc>, window_params = [{pipeline_mode = #tpu.pipeline_mode<synchronous>, transform_indices = @transform_0, window_bounds = array<i64: 128, 256>}, {transform_indices = @transform_1, window_bounds = array<i64: 8, 128>}, {transform_indices = @transform_2, window_bounds = array<i64: 8, 256>}]} {
    %c0 = arith.constant 0 : index
    %c0_0 = arith.constant 0 : index
    %0 = vector.load %arg2[%c0, %c0_0] : memref<8x128xf32, #tpu.memory_space<vmem>>, vector<8x128xf32>
    %c0_1 = arith.constant 0 : index
    %c0_2 = arith.constant 0 : index
    %1 = vector.load %arg1[%c0_1, %c0_2] : memref<128x256xf32, #tpu.memory_space<vmem>>, vector<128x256xf32>
    %cst = arith.constant dense<0.000000e+00> : vector<8x256xf32>
    %2 = tpu.matmul %0, %1, %cst {dimension_numbers = #tpu.dot_dimension_numbers<[1], [0], [0], [1], [0, 0, 1, 1], [], []>} : vector<8x128xf32>, vector<128x256xf32>, vector<8x256xf32> -> vector<8x256xf32>
    %c0_3 = arith.constant 0 : index
    %c0_4 = arith.constant 0 : index
    %3 = vector.load %arg3[%c0_3, %c0_4] : memref<8x256xf32, #tpu.memory_space<vmem>>, vector<8x256xf32>
    tpu.vector_store %arg3[%c0_3, %c0_4], %2 {strides = array<i32>} : memref<8x256xf32, #tpu.memory_space<vmem>>, vector<8x256xf32>,
    return
  }
  func.func @transform_0(%arg0: i32) -> (i32, i32) {
    %c0_i32 = arith.constant 0 : i32
    %c0_i32_0 = arith.constant 0 : i32
    %c0_i32_1 = arith.constant 0 : i32
    return %c0_i32, %c0_i32_0 : i32, i32
  }
  func.func @transform_1(%arg0: i32) -> (i32, i32) {
    %c0_i32 = arith.constant 0 : i32
    %c0_i32_0 = arith.constant 0 : i32
    return %arg0, %c0_i32 : i32, i32
  }
  func.func @transform_2(%arg0: i32) -> (i32, i32) {
    %c0_i32 = arith.constant 0 : i32
    %c0_i32_0 = arith.constant 0 : i32
    return %arg0, %c0_i32 : i32, i32
  }
}

</mosaic_0001>

<bundles_post_ra>
// kernel: tpu_custom_call.1
= control target key start
LH: loop header
LB: loop body
LE: loop exit
PB: predicated region body
PF: predicated region fallthrough
CT: control target
= control target key end

     0   :  { %7 = vsyncpa [#allocation3], 0  ;;  %s323_s0 = inlined_call_operand.hbm [shape: f32[128,256], index: 0, kind: input, shape index: {}]   ;;  %s324_s1 = inlined_call_operand.vmem [shape: f32[1,128], index: 1, kind: input, shape index: {}]   ;;  %s325_s2 = inlined_call_operand.hbm [shape: f32[1,256], index: 2, kind: output, shape index: {}]  }
   0x1   :  { %8 = vsyncpa [#allocation4], 0  ;;  %s271_s9 = smov [#allocation2]  }
   0x2   :  { %s14_s10 = sshll.u32 %s271_s9, 4  ;;  %s15_s10 = int_to_ptr.vmem [resolvable:$true] %s14_s10 }
   0x3   :  { %s235_s11 = scalar_lea.vmem %s15_s10, 4096  ;;  %p240_p1 = scmp.lt.s32.totalorder %s15_s10, %s15_s10 }
   0x4   :  { %p236_p0 = scmp.ne.s32.totalorder %s15_s10, %s235_s11  ;;  %p241_p2 = scmp.lt.s32.totalorder %s235_s11, %s235_s11 }
   0x6   :  { %p242_p3 = por %p241_p2, %p240_p1 }
   0x8   :  { %p243_p4 = pnand %p242_p3, %p236_p0 }
   0xa   :  { %246 = shalt.err (!%p243_p4)
}
   0xb   :  { %s272_s12 = smov 256   ;;  %s273_s13 = smov 16  }
   0xc   :  { %20 = dma.hbm_to_vmem [thread:$0]  %s323_s0, 4096, %s15_s10, [#allocation3], %s272_s12, %s272_s12, %s273_s13  }
   0xd   :  { %267 = dma.done.wait [#allocation3], 4096  }
   0xe   :  { %268 = vsyncadd [#allocation3], 4294963200  ;;  %v274_v0 = vmov 0.0   ;;  %v58_v1 = vld [vmem:[#allocation2 + $0xf8] sm:$0xff]  ;;  %v57_v2 = vld [vmem:[#allocation2 + $0xf0] sm:$0xff]  ;;  %v137_v36 = vlaneseq }
   0xf   :  { %123 = vmatprep.mubr.f32.mxu0 %v274_v0  ;;  %v56_v3 = vld [vmem:[#allocation2 + $0xe8] sm:$0xff]  ;;  %59 = vmatprep.subr.mxu0 %v58_v1  ;;  %v55_v4 = vld [vmem:[#allocation2 + $0xe0] sm:$0xff]  ;;  %v54_v5 = vld [vmem:[#allocation2 + $0xd8] sm:$0xff]  ;;  %v275_v34 = vmov 1966171168  }
  0x10   :  { %60 = vmatpush1.msra.mxu0 %v57_v2  ;;  %v53_v6 = vld [vmem:[#allocation2 + $0xd0] sm:$0xff]  ;;  %v52_v7 = vld [vmem:[#allocation2 + $0xc8] sm:$0xff]  ;;  %v51_v8 = vld [vmem:[#allocation2 + $0xc0] sm:$0xff]  ;;  %v135_v35 = vunpack.c.l.s4 %v275_v34  ;;  %v138_v38 = vshrl.u32 %v137_v36, 7  ;;  %vm300_vm0 = vcmp.lt.s32.totalorder %v137_v36, 256 }
  0x11   :  { %61 = vmatprep.subr.mxu0 %v56_v3  ;;  %v50_v9 = vld [vmem:[#allocation2 + $0xb8] sm:$0xff]  ;;  %v49_v10 = vld [vmem:[#allocation2 + $0xb0] sm:$0xff]  ;;  %v48_v11 = vld [vmem:[#allocation2 + $0xa8] sm:$0xff] }
  0x12   :  { %62 = vmatpush1.msra.mxu0 %v55_v4  ;;  %v47_v12 = vld [vmem:[#allocation2 + $0xa0] sm:$0xff]  ;;  %v46_v13 = vld [vmem:[#allocation2 + $0x98] sm:$0xff]  ;;  %v45_v14 = vld [vmem:[#allocation2 + $0x90] sm:$0xff]  ;;  %v136_v37 = vunpack.c.0.s8 %v135_v35 }
  0x13   :  { %63 = vmatprep.subr.mxu0 %v54_v5  ;;  %v44_v15 = vld [vmem:[#allocation2 + $0x88] sm:$0xff]  ;;  %v43_v16 = vld [vmem:[#allocation2 + $0x80] sm:$0xff]  ;;  %v42_v17 = vld [vmem:[#allocation2 + $0x78] sm:$0xff] }
  0x14   :  { %64 = vmatpush1.msra.mxu0 %v53_v6  ;;  %v41_v18 = vld [vmem:[#allocation2 + $0x70] sm:$0xff]  ;;  %v40_v19 = vld [vmem:[#allocation2 + $0x68] sm:$0xff]  ;;  %v39_v20 = vld [vmem:[#allocation2 + $0x60] sm:$0xff]  ;;  %v139_v40 = vsub.s32 %v136_v37, %v138_v38 }
  0x15   :  { %65 = vmatprep.subr.mxu0 %v52_v7  ;;  %v38_v21 = vld [vmem:[#allocation2 + $0x58] sm:$0xff]  ;;  %v37_v22 = vld [vmem:[#allocation2 + $0x50] sm:$0xff]  ;;  %v36_v23 = vld [vmem:[#allocation2 + $0x48] sm:$0xff] }
  0x16   :  { %66 = vmatpush1.msra.mxu0 %v51_v8  ;;  %v35_v24 = vld [vmem:[#allocation2 + $0x40] sm:$0xff]  ;;  %v34_v25 = vld [vmem:[#allocation2 + $0x38] sm:$0xff]  ;;  %v33_v26 = vld [vmem:[#allocation2 + $0x30] sm:$0xff] }
  0x17   :  { %67 = vmatprep.subr.mxu0 %v50_v9  ;;  %v32_v27 = vld [vmem:[#allocation2 + $0x28] sm:$0xff]  ;;  %v31_v28 = vld [vmem:[#allocation2 + $0x20] sm:$0xff]  ;;  %v30_v29 = vld [vmem:[#allocation2 + $0x18] sm:$0xff] }
  0x18   :  { %68 = vmatpush1.msra.mxu0 %v49_v10  ;;  %v29_v30 = vld [vmem:[#allocation2 + $0x10] sm:$0xff]  ;;  %v28_v31 = vld [vmem:[#allocation2 + $0x8] sm:$0xff]  ;;  %v27_v32 = vld [vmem:[#allocation2] sm:$0xff] }
  0x19   :  { %69 = vmatprep.subr.mxu0 %v48_v11  ;;  %v26_v33 = vld [vmem:[%s324_s1] sm:$0xff] }
  0x1a   :  { %70 = vmatpush1.msra.mxu0 %v47_v12 }
  0x1b   :  { %71 = vmatprep.subr.mxu0 %v46_v13 }
  0x1c   :  { %72 = vmatpush1.msra.mxu0 %v45_v14 }
  0x1d   :  { %73 = vmatprep.subr.mxu0 %v44_v15 }
  0x1e   :  { %74 = vmatpush1.msra.mxu0 %v43_v16 }
  0x1f   :  { %75 = vmatprep.subr.mxu0 %v42_v17 }
  0x20   :  { %76 = vmatpush1.msra.mxu0 %v41_v18 }
  0x21   :  { %77 = vmatprep.subr.mxu0 %v40_v19 }
  0x22   :  { %78 = vmatpush1.msra.mxu0 %v39_v20 }
  0x23   :  { %79 = vmatprep.subr.mxu0 %v38_v21 }
  0x24   :  { %80 = vmatpush1.msra.mxu0 %v37_v22 }
  0x25   :  { %81 = vmatprep.subr.mxu0 %v36_v23 }
  0x26   :  { %82 = vmatpush1.msra.mxu0 %v35_v24 }
  0x27   :  { %83 = vmatprep.subr.mxu0 %v34_v25 }
  0x28   :  { %84 = vmatpush1.msra.mxu0 %v33_v26 }
  0x29   :  { %85 = vmatprep.subr.mxu0 %v32_v27 }
  0x2a   :  { %86 = vmatpush1.msra.mxu0 %v31_v28 }
  0x2b   :  { %87 = vmatprep.subr.mxu0 %v30_v29 }
  0x2c   :  { %88 = vmatpush1.msra.mxu0 %v29_v30 }
  0x2d   :  { %89 = vmatprep.subr.mxu0 %v28_v31 }
  0x2e   :  { %90 = vmatpush1.msra.mxu0 %v27_v32 }
  0x2f   :  { %124 = vmatmul.mubr.f32.vlgmr.msra.gmra.mxu0 %v26_v33 }
  0xef   :  { %v125_v39 = vpop.f32.mrf.mxu0 }
  0xf1   :  { %v127_v41 = vpop.f32.mrf.mxu0 }
  0xf2   :  { %v132_v42 = vcombine.low %v125_v39, %v127_v41  ;;  %v133_v43 = vcombine.high %v125_v39, %v127_v41 }
  0xf4   :  { %v140_v44 = vrot.slane %v132_v42, %v139_v40  ;;  %v147_v45 = vrot.slane %v133_v43, %v139_v40 }
  0xf6   :  { %v148_v47 = vcombine.high %v140_v44, %v140_v44  ;;  %v149_v48 = vcombine.high %v147_v45, %v147_v45  ;;  %v156_v49 = vrot.slane %v140_v44, %v139_v40  ;;  %v163_v50 = vrot.slane %v147_v45, %v139_v40 }
  0xf8   :  { %v170_v51 = vrot.slane %v148_v47, %v139_v40  ;;  %v177_v52 = vrot.slane %v149_v48, %v139_v40  ;;  %v178_v53 = vcombine.high %v156_v49, %v156_v49  ;;  %v179_v54 = vcombine.high %v163_v50, %v163_v50  ;;  %194 = vst.msk [vmem:[#allocation5] sm:$0x3] %vm300_vm0, %v156_v49 }
  0xf9   :  { %198 = vst.msk [vmem:[#allocation5 + $0x8] sm:$0x3] %vm300_vm0, %v163_v50 }
  0xfa   :  { %v180_v55 = vcombine.high %v170_v51, %v170_v51  ;;  %v181_v56 = vcombine.high %v177_v52, %v177_v52  ;;  %195 = vst.msk [vmem:[#allocation5 + $0x2] sm:$0x3] %vm300_vm0, %v170_v51  ;;  %196 = vst.msk [vmem:[#allocation5 + $0x4] sm:$0x3] %vm300_vm0, %v178_v53 }
  0xfb   :  { %199 = vst.msk [vmem:[#allocation5 + $0xa] sm:$0x3] %vm300_vm0, %v177_v52  ;;  %200 = vst.msk [vmem:[#allocation5 + $0xc] sm:$0x3] %vm300_vm0, %v179_v54 }
  0xfc   :  { %197 = vst.msk [vmem:[#allocation5 + $0x6] sm:$0x3] %vm300_vm0, %v180_v55  ;;  %201 = vst.msk [vmem:[#allocation5 + $0xe] sm:$0x3] %vm300_vm0, %v181_v56 }
  0xfd   :  { %206 = vsyncadd [#allocation4], 224  ;;  %s276_s1 = smov [#allocation5]  }
  0xfe   :  { %s207_s17 = sshll.u32 %s276_s1, 4  ;;  %s208_s17 = int_to_ptr.vmem [resolvable:$true] %s207_s17 }
  0xff   :  { %s247_s18 = scalar_lea.vmem %s208_s17, 32  ;;  %s251_s19 = scalar_lea.vmem %s208_s17, 256 }
 0x100   :  { %p248_p5 = scmp.ne.s32.totalorder %s208_s17, %s247_s18  ;;  %p252_p6 = scmp.lt.s32.totalorder %s208_s17, %s208_s17 }
 0x101   :  { %p253_p7 = scmp.lt.s32.totalorder %s251_s19, %s247_s18 }
 0x103   :  { %p254_p8 = por %p253_p7, %p252_p6 }
 0x105   :  { %p255_p9 = pnand %p254_p8, %p248_p5 }
 0x107   :  { %258 = shalt.err (!%p255_p9)
}
 0x108   :  { %s277_s20 = smov 32   ;;  %s278_s21 = smov 2  }
 0x109   :  { %213 = dma.vmem_to_hbm [thread:$0]  %s208_s17, 32, %s325_s2, [#allocation4], %s277_s20, %s277_s20, %s278_s21  }
 0x10a   :  { %269 = dma.done.wait [#allocation4], 256  }
 0x10b   :  { %270 = vsyncadd [#allocation4], 4294967040 }
 0x10c   :  { %217 = vsyncpa [#allocation3], 1 }
 0x10d   :  { %218 = vsyncpa [#allocation4], 1 }

</bundles_post_ra>
